<compile_context>
chip_gen: v7x
topology: tpu7x:2x2x1
jax: 0.10.0
libtpu: 0.0.40
codegen_flags: <defaults>
</compile_context>

<pallas_src>
import jax
import jax.numpy as jnp
from jax import lax
from jax.experimental import pallas as pl
from jax.experimental.pallas import tpu as pltpu


# --------------------------------------------------------------------------
# Kernel: one MXU matmul + BN-shift + ReLU epilogue, bf16 store.
# --------------------------------------------------------------------------
def _deconv3d_kernel(x_ref, w_ref, shift_ref, o_ref):
    # x_ref:     (R, 8*Cin)      bf16 rows; 8 = (dd,dh,dw) taps folded into channels
    # w_ref:     (8*Cin, 8*Co_p) bf16 polyphase weight, BN scale pre-folded
    # shift_ref: (1, 8*Co_p)     f32 BN shift (beta - mean*gamma/std), phase-tiled
    # o_ref:     (R, 8*Co_p)     bf16 output rows (8 output phases interleaved on lanes)
    acc = jnp.dot(x_ref[...], w_ref[...], preferred_element_type=jnp.float32)
    y = jnp.maximum(acc + shift_ref[...], 0.0)          # BatchNorm shift + ReLU
    o_ref[...] = y.astype(o_ref.dtype)


# --------------------------------------------------------------------------
# Wrapper helpers
# --------------------------------------------------------------------------
def _build_polyphase_weight(w_scaled, cin, cout, cout_pad):
    """Combined weight W[(dd,dh,dw,ci), (pd,ph,pw,co_pad)] for stride=2, K=3,
    padding=1, output_padding=1.

    Per dimension, (input offset d, output phase p) -> kernel tap k:
        (0,0)->1, (0,1)->2, (1,1)->0, (1,0)-> inactive (zero).
    w_scaled: (Cin, Cout, 3, 3, 3) float32, BN scale already folded on Cout.
    """
    pairs = [(0, 0, 1), (0, 1, 2), (1, 1, 0)]     # (d_offset, phase, k_index)
    wc = jnp.zeros((2, 2, 2, cin, 2, 2, 2, cout_pad), jnp.float32)
    for dd, pd, kd in pairs:
        for dh, ph, kh in pairs:
            for dw, pw, kw in pairs:
                wc = wc.at[dd, dh, dw, :, pd, ph, pw, :cout].set(
                    w_scaled[:, :, kd, kh, kw])
    return wc.reshape(8 * cin, 8 * cout_pad)


def _vmem_limit_bytes():
    """Generation-aware scoped-VMEM limit: ~48 MiB on v7x (64 MiB physical),
    ~96 MiB on v5e/v6e (128 MiB physical)."""
    try:
        cap = pltpu.get_tpu_info().vmem_capacity_bytes
    except Exception:
        cap = 64 * 1024 * 1024        # conservative (v7x-sized) fallback
    return max(32 << 20, min(int(cap * 0.75), 100 << 20))


def _pick_row_block(total_rows, max_rows):
    """Largest multiple-of-8 divisor of total_rows that fits the VMEM budget,
    preferring an even grid extent (>=2) so v7x's two TensorCores both work."""
    cands = []
    r = 8
    limit = min(total_rows, max(8, max_rows))
    while r <= limit:
        if total_rows % r == 0:
            cands.append(r)
        r += 8
    if not cands:
        return total_rows            # degenerate tiny / odd case: single block
    even = [r for r in cands if (total_rows // r) >= 2 and (total_rows // r) % 2 == 0]
    return max(even) if even else max(cands)


# --------------------------------------------------------------------------
# Forward pass
# --------------------------------------------------------------------------
def deconv3d_forward(x_ncdhw, w_pt, gamma, beta, running_mean, running_var,
                     *, stride=2, padding=1, output_padding=1, eps=1e-5,
                     out_dtype=jnp.float32):
    """Deconv3d forward (bn=True, relu=True, bias=False).

    x_ncdhw: (N, Cin, D, H, W) float32 (PyTorch NCDHW convention)
    w_pt:    (Cin, Cout, K, K, K) ConvTranspose3d weight layout
    """
    N, Cin, D, H, W = x_ncdhw.shape
    Cin_w, Cout, K = w_pt.shape[0], w_pt.shape[1], w_pt.shape[2]
    assert Cin == Cin_w
    # TODO(synk): only the standard MVSNet config (stride=2, K=3, padding=1,
    # output_padding=1) is implemented by the polyphase fast path.
    assert (stride, K, padding, output_padding) == (2, 3, 1, 1)

    # Lane-dense output: pad Cout so 8*Cout_pad is a multiple of 128.
    Cout_pad = ((Cout + 15) // 16) * 16
    Cw = 8 * Cin          # contraction width  (dd,dh,dw,ci)
    Kw = 8 * Cout_pad     # output width       (pd,ph,pw,co_pad)

    # ---- wrapper-side layout glue (done once, in bf16) --------------------
    x = jnp.transpose(x_ncdhw, (0, 2, 3, 4, 1)).astype(jnp.bfloat16)   # NDHWC
    # high-pad each spatial dim by 1 (virtual zero plane at index D/H/W)
    x_p = jnp.pad(x, ((0, 0), (0, 1), (0, 1), (0, 1), (0, 0)))
    # fold ALL (dd, dh, dw) window offsets into the channel axis: last dim = 8*Cin
    shifts = []
    for dd in (0, 1):
        for dh in (0, 1):
            for dw in (0, 1):
                shifts.append(x_p[:, dd:dd + D, dh:dh + H, dw:dw + W, :])
    x_rows = jnp.concatenate(shifts, axis=-1).reshape(N * D * H * W, Cw)

    # BatchNorm (inference / running stats): fold scale into the weight,
    # keep only the shift (+ReLU) as the kernel epilogue.
    inv_std = 1.0 / jnp.sqrt(running_var + eps)
    scale = gamma * inv_std                                   # (Cout,)
    shift = beta - running_mean * scale                       # (Cout,)
    w_scaled = w_pt.astype(jnp.float32) * scale[None, :, None, None, None]
    w_k = _build_polyphase_weight(w_scaled, Cin, Cout, Cout_pad).astype(jnp.bfloat16)
    shift_pad = jnp.zeros((Cout_pad,), jnp.float32).at[:Cout].set(shift)
    shift8 = jnp.tile(shift_pad, 8).reshape(1, Kw)            # co fastest, matches cols

    # ---- tiling: big row blocks, generation-aware VMEM budget -------------
    total_rows = N * D * H * W
    vmem_limit = _vmem_limit_bytes()
    budget = int(vmem_limit * 0.6)                    # headroom for compiler scratch
    fixed = 2 * Cw * Kw * 2 + 2 * Kw * 4              # (double-buffered) weight + shift
    per_row = 2 * (Cw * 2 + Kw * 2)                   # in + out blocks, double-buffered
    max_rows = max(8, (budget - fixed) // per_row)
    R = _pick_row_block(total_rows, max_rows)
    grid = (total_rows // R,)

    out_rows = pl.pallas_call(
        _deconv3d_kernel,
        out_shape=jax.ShapeDtypeStruct((total_rows, Kw), jnp.bfloat16),
        grid_spec=pltpu.PrefetchScalarGridSpec(
            num_scalar_prefetch=0,
            grid=grid,
            in_specs=[
                pl.BlockSpec((R, Cw), lambda r: (r, 0)),       # activation rows
                pl.BlockSpec((Cw, Kw), lambda r: (0, 0)),      # constant weight
                pl.BlockSpec((1, Kw), lambda r: (0, 0)),       # constant BN shift
            ],
            out_specs=pl.BlockSpec((R, Kw), lambda r: (r, 0)),
        ),
        compiler_params=pltpu.CompilerParams(
            dimension_semantics=("parallel",),
            vmem_limit_bytes=vmem_limit),
    )(x_rows, w_k, shift8)

    # de-interleave the 8 output phases (layout plumbing, in bf16) -> NCDHW
    y = out_rows.reshape(N, D, H, W, 2, 2, 2, Cout_pad)[..., :Cout]
    y = jnp.transpose(y, (0, 7, 1, 4, 2, 5, 3, 6))    # (n,co,jd,pd,jh,ph,jw,pw)
    return y.reshape(N, Cout, 2 * D, 2 * H, 2 * W).astype(out_dtype)


# --------------------------------------------------------------------------
# Pure-JAX reference (mirrors the kernel's quantization: bf16 inputs,
# BN-scale-folded bf16 weights, f32 accumulation).
# --------------------------------------------------------------------------
def _ref_forward(x_ncdhw, w_pt, gamma, beta, running_mean, running_var,
                 *, stride, padding, output_padding, eps=1e-5):
    K = w_pt.shape[2]
    inv_std = 1.0 / jnp.sqrt(running_var + eps)
    scale = gamma * inv_std
    shift = beta - running_mean * scale
    xq = x_ncdhw.astype(jnp.bfloat16).astype(jnp.float32)
    w_folded = w_pt.astype(jnp.float32) * scale[None, :, None, None, None]
    wq = w_folded.astype(jnp.bfloat16).astype(jnp.float32)
    x = jnp.transpose(xq, (0, 2, 3, 4, 1))
    w_eq = jnp.transpose(wq[:, :, ::-1, ::-1, ::-1], (2, 3, 4, 0, 1))
    lo = K - 1 - padding
    hi = K - 1 - padding + output_padding
    y = lax.conv_general_dilated(
        x, w_eq, window_strides=(1, 1, 1),
        padding=[(lo, hi)] * 3,
        lhs_dilation=(stride, stride, stride),
        dimension_numbers=("NDHWC", "DHWIO", "NDHWC"),
        precision=lax.Precision.HIGHEST)
    y = jnp.maximum(y + shift, 0.0)
    return jnp.transpose(y, (0, 4, 1, 2, 3))


if __name__ == "__main__":
    # Deconv3d(in_channels=4, out_channels=8, kernel_size=3, stride=2,
    #          padding=1, output_padding=1, relu=True, bn=True)
    N, Cin, Cout, D, H, W, K = 2, 4, 8, 4, 8, 8, 3
    stride, padding, output_padding = 2, 1, 1

    key = jax.random.PRNGKey(0)
    k1, k2, k3, k4, k5, k6 = jax.random.split(key, 6)

    x = jax.random.normal(k1, (N, Cin, D, H, W), jnp.float32)

    # ConvTranspose3d weight (in_channels, out_channels, K, K, K); no bias (bn=True).
    fan = Cin * K * K * K
    bound = 1.0 / (fan ** 0.5)
    w = jax.random.uniform(k2, (Cin, Cout, K, K, K), jnp.float32, -bound, bound)

    # BatchNorm3d parameters / running stats (deterministic, non-trivial).
    gamma = 1.0 + 0.1 * jax.random.normal(k3, (Cout,), jnp.float32)
    beta = 0.1 * jax.random.normal(k4, (Cout,), jnp.float32)
    running_mean = 0.1 * jax.random.normal(k5, (Cout,), jnp.float32)
    running_var = 1.0 + 0.2 * jax.random.uniform(k6, (Cout,), jnp.float32)

    # TODO(synk): BatchNorm is evaluated in inference mode (running stats);
    # training-mode batch-statistics BN / running-stat updates are not modeled.
    out = deconv3d_forward(x, w, gamma, beta, running_mean, running_var,
                           stride=stride, padding=padding,
                           output_padding=output_padding)
    out = jax.block_until_ready(out)

    Dout = (D - 1) * stride - 2 * padding + K + output_padding
    Hout = (H - 1) * stride - 2 * padding + K + output_padding
    Wout = (W - 1) * stride - 2 * padding + K + output_padding
    assert out.shape == (N, Cout, Dout, Hout, Wout), out.shape

    ref = _ref_forward(x, w, gamma, beta, running_mean, running_var,
                       stride=stride, padding=padding,
                       output_padding=output_padding)
    # Tolerance covers the kernel's final bf16 output rounding (~2^-9 relative).
    if not jnp.allclose(out, ref, atol=1e-2, rtol=1e-2):
        raise AssertionError(
            f"mismatch vs reference, max abs err = {jnp.max(jnp.abs(out - ref))}")

    print("KERNEL_OK")
</pallas_src>

<mosaic_0001>
module attributes {stable_mosaic.version = 11 : i64} {
  func.func @_deconv3d_kernel(%arg0: i32, %arg1: memref<256x32xbf16, #tpu.memory_space<vmem>>, %arg2: memref<32x128xbf16, #tpu.memory_space<vmem>>, %arg3: memref<1x128xf32, #tpu.memory_space<vmem>>, %arg4: memref<256x128xbf16, #tpu.memory_space<vmem>>) attributes {dimension_semantics = [#tpu.dimension_semantics<parallel>], iteration_bounds = array<i64: 2>, scalar_prefetch = 0 : i64, scratch_operands = 0 : i64, tpu.core_type = #tpu.core_type<tc>, window_params = [{transform_indices = @transform_0, window_bounds = array<i64: 256, 32>}, {pipeline_mode = #tpu.pipeline_mode<synchronous>, transform_indices = @transform_1, window_bounds = array<i64: 32, 128>}, {pipeline_mode = #tpu.pipeline_mode<synchronous>, transform_indices = @transform_2, window_bounds = array<i64: 1, 128>}, {transform_indices = @transform_3, window_bounds = array<i64: 256, 128>}]} {
    %c0 = arith.constant 0 : index
    %c0_0 = arith.constant 0 : index
    %0 = vector.load %arg1[%c0, %c0_0] : memref<256x32xbf16, #tpu.memory_space<vmem>>, vector<256x32xbf16>
    %c0_1 = arith.constant 0 : index
    %c0_2 = arith.constant 0 : index
    %1 = vector.load %arg2[%c0_1, %c0_2] : memref<32x128xbf16, #tpu.memory_space<vmem>>, vector<32x128xbf16>
    %cst = arith.constant dense<0.000000e+00> : vector<256x128xf32>
    %2 = tpu.matmul %0, %1, %cst {dimension_numbers = #tpu.dot_dimension_numbers<[1], [0], [0], [1], [0, 0, 1, 1], [], []>} : vector<256x32xbf16>, vector<32x128xbf16>, vector<256x128xf32> -> vector<256x128xf32>
    %c0_3 = arith.constant 0 : index
    %c0_4 = arith.constant 0 : index
    %3 = vector.load %arg3[%c0_3, %c0_4] : memref<1x128xf32, #tpu.memory_space<vmem>>, vector<1x128xf32>
    %4 = vector.broadcast %3 : vector<1x128xf32> to vector<256x128xf32>
    %5 = arith.addf %2, %4 : vector<256x128xf32>
    %cst_5 = arith.constant 0.000000e+00 : f32
    %6 = vector.broadcast %cst_5 : f32 to vector<256x128xf32>
    %7 = arith.maximumf %5, %6 : vector<256x128xf32>
    %8 = arith.truncf %7 : vector<256x128xf32> to vector<256x128xbf16>
    %c0_6 = arith.constant 0 : index
    %c0_7 = arith.constant 0 : index
    %9 = vector.load %arg4[%c0_6, %c0_7] : memref<256x128xbf16, #tpu.memory_space<vmem>>, vector<256x128xbf16>
    tpu.vector_store %arg4[%c0_6, %c0_7], %8 {strides = array<i32>} : memref<256x128xbf16, #tpu.memory_space<vmem>>, vector<256x128xbf16>,
    return
  }
  func.func @transform_0(%arg0: i32) -> (i32, i32) {
    %c0_i32 = arith.constant 0 : i32
    %c0_i32_0 = arith.constant 0 : i32
    return %arg0, %c0_i32 : i32, i32
  }
  func.func @transform_1(%arg0: i32) -> (i32, i32) {
    %c0_i32 = arith.constant 0 : i32
    %c0_i32_0 = arith.constant 0 : i32
    %c0_i32_1 = arith.constant 0 : i32
    return %c0_i32, %c0_i32_0 : i32, i32
  }
  func.func @transform_2(%arg0: i32) -> (i32, i32) {
    %c0_i32 = arith.constant 0 : i32
    %c0_i32_0 = arith.constant 0 : i32
    %c0_i32_1 = arith.constant 0 : i32
    return %c0_i32, %c0_i32_0 : i32, i32
  }
  func.func @transform_3(%arg0: i32) -> (i32, i32) {
    %c0_i32 = arith.constant 0 : i32
    %c0_i32_0 = arith.constant 0 : i32
    return %arg0, %c0_i32 : i32, i32
  }
}

</mosaic_0001>

<bundles_post_ra>
// kernel: tpu_custom_call.1
= control target key start
LH: loop header
LB: loop body
LE: loop exit
PB: predicated region body
PF: predicated region fallthrough
CT: control target
= control target key end

     0   :  { %8 = vsyncpa [#allocation3], 0  ;;  %s1399_s0 = inlined_call_operand.vmem [shape: bf16[512,32], index: 0, kind: input, shape index: {}]   ;;  %s1400_s1 = inlined_call_operand.vmem [shape: bf16[32,128], index: 1, kind: input, shape index: {}]   ;;  %s1401_s2 = inlined_call_operand.vmem [shape: f32[1,128], index: 2, kind: input, shape index: {}]   ;;  %s1402_s3 = inlined_call_operand.hbm [shape: bf16[512,128], index: 3, kind: output, shape index: {}]  }
   0x1   :  { %10 = vsyncpa [#allocation3 + $0x1], 0  ;;  %s1197_s12 = smov 0   ;;  %s1199_s13 = smov 0  }
   0x2   :  { %s1201_s14 = smov 0   ;;  %s1203_s15 = smov 0  }
   0x3 LB: > { %s1218_s16 = sadd.s32 4294967295, %s1172_s15   ;;  %s786_s17 = sadd.s32 4294967294, %s1172_s15   ;;  %s1172_s15 = sphi %s1203_s15, %s1408_s15   ;;  %s1168_s14 = sphi %s1201_s14, %s1407_s14   ;;  %s1164_s13 = sphi %s1199_s13, %s1406_s13   ;;  %s1160_s12 = sphi %s1197_s12, %s1405_s12  }
   0x4   : > { %s1222_s18 = sadd.s32 1, %s1172_s15   ;;  %s91_s19 = sadd.s32 1, %s1168_s14 }
   0x5   : > { %s88_s20 = ssub.s32 %s1172_s15, %s1222_s18  ;;  %p101_p0 = scmp.ne.s32.totalorder %s1168_s14, %s1164_s13 }
   0x6   : > { %p89_p1 = scmp.eq.s32.totalorder %s88_s20, 0  ;;  %p102_p2 = scmp.eq.s32.totalorder %s1218_s16, 1 }
   0x7   : > { %p107_p3 = scmp.ne.s32.totalorder %s1164_s13, %s1160_s12  ;;  %p108_p4 = scmp.eq.s32.totalorder %s786_s17, 1 }
   0x8   : > { %s1233_s21 = scalar_select %p89_p1, %s1168_s14, %s91_s19  }
   0x9   : > { %p1235_p5 = por %p102_p2, %p101_p0  ;;  %p1239_p6 = por %p108_p4, %p107_p3 }
   0xa   : > { %p789_p7 = scmp.ge.s32.totalorder %s1172_s15, 1  ;;  %p141_p8 = scmp.lt.s32.totalorder %s1172_s15, 3 }
   0xc   : > { %p142_p9 = pnand %p789_p7, %p141_p8 }
   0xd   : > { %v1092_v0 = vld [vmem:[%s1400_s1] sm:$0xff] (!%p142_p9)   ;;  %s791_s26 = sshll.u32 (!%p142_p9), %s1218_s16, 5  ;;  %v1093_v1 = vld [vmem:[%s1400_s1 + $0x8] sm:$0xff] (!%p142_p9)   ;;  %vm308_vm0 = vcmask (!%p142_p9), 261120   ;;  %s162_s8 = sand.u32 (!%p142_p9), 1, %s1164_s13  }
   0xe   : > { %145 = sbr.rel (%p142_p9) target bundleno = 287 (0x11f), region = 32  ;;  %p166_p10 = scmp.lt.s32.totalorder (!%p142_p9), %s791_s26, 63  ;;  %1011 = vmatprep.subr.bf16.mxu0 (!%p142_p9), %v1092_v0  ;;  %1047 = vmatprep.subr.bf16.mxu1 (!%p142_p9), %v1092_v0  ;;  %v1292_v18 = vld [vmem:[%s1401_s2] ss:$0 sm:$0xff] (!%p142_p9) }
   0xf   : > { %1012 = vmatpush3.bf16.msra.mxu0 (!%p142_p9), %v1092_v0  ;;  %1049 = vmatpush3.bf16.msra.mxu1 (!%p142_p9), %v1092_v0  ;;  %s790_s9 = sshll.u32 (!%p142_p9), %s162_s8, 7  ;;  %s897_s11 = sshll.u32 (!%p142_p9), %s1218_s16, 11 }
  0x10   : > { %1013 = vmatprep.subr.bf16.mxu0 (!%p142_p9), %v1093_v1  ;;  %1048 = vmatprep.subr.bf16.mxu1 (!%p142_p9), %v1093_v1  ;;  %s1305_s10 = scalar_lea.vmem (!%p142_p9), [#allocation2], %s790_s9  ;;  %s1348_s24 = scalar_lea.hbm (!%p142_p9), %s1402_s3, %s897_s11 }
  0x11   : > { %s724_s17 = sshll.u32 (!%p142_p9), %s1305_s10, 4  ;;  %s1358_s16 = scalar_lea.sflag (!%p142_p9), [#allocation3], %s162_s8  ;;  %s1350_s17 = int_to_ptr.vmem [resolvable:$true] %s724_s17 }
  0x12   : > { %s1110_s25 = scalar_lea.vmem (!%p142_p9), %s1350_s17, 2048 }
  0x13   : > { %1014 = vmatpush3.bf16.msra.mxu0 (!%p142_p9), %v1093_v1  ;;  %1050 = vmatpush3.bf16.msra.mxu1 (!%p142_p9), %v1093_v1  ;;  %p1111_p11 = scmp.ne.s32.totalorder (!%p142_p9), %s1350_s17, %s1110_s25 }
  0x15   : > { %s1410_s26 = smov (!%p166_p10, %s791_s26), 63  ;;  %p1112_p12 = pnand %p1111_p11, %p1235_p5 }
  0x16   : > { %s792_s29 = sshll.u32 %s1410_s26, 2  ;;  %s1174_s26 = smov [#allocation2]  }
  0x17   : > { %s1255_s5 = scalar_lea.vmem %s1399_s0, %s792_s29  ;;  %p1113_p13 = pneg %p1112_p12 }
  0x18   : > { %v1094_v2 = vld [vmem:[%s1255_s5] sm:$0xff]   ;;  %v1096_v4 = vld [vmem:[%s1255_s5 + $0x8] sm:$0xff]   ;;  %v1098_v6 = vld [vmem:[%s1255_s5 + $0x10] sm:$0xff]   ;;  %s1114_s27 = sshll.u32 %s1174_s26, 4  ;;  %s1115_s27 = int_to_ptr.vmem [resolvable:$false] %s1114_s27 }
  0x19   : > { %v1095_v3 = vld [vmem:[%s1255_s5 + $0x40] sm:$0xff]   ;;  %1015 = vmatprep.mubr.msk.bf16.mxu0 %vm308_vm0, %v1094_v2  ;;  %v1097_v5 = vld [vmem:[%s1255_s5 + $0x48] sm:$0xff]   ;;  %v1099_v7 = vld [vmem:[%s1255_s5 + $0x50] sm:$0xff]   ;;  %s1116_s28 = scalar_lea.vmem %s1115_s27, 4096  ;;  %p1117_p0 = scmp.lt.s32.totalorder %s1350_s17, %s1115_s27 }
  0x1a   : > { %1031 = vmatprep.mubr.msk.bf16.mxu1 %vm308_vm0, %v1095_v3  ;;  %1016 = vmatmul.mubr.msk.bf16.vlgmr.msra.gmra.mrb[0].mxu0 %vm308_vm0, %v1096_v4  ;;  %v1100_v8 = vld [vmem:[%s1255_s5 + $0x18] sm:$0xff]   ;;  %v1102_v10 = vld [vmem:[%s1255_s5 + $0x20] sm:$0xff]   ;;  %v1104_v12 = vld [vmem:[%s1255_s5 + $0x28] sm:$0xff]   ;;  %p1118_p1 = scmp.lt.s32.totalorder %s1116_s28, %s1110_s25 }
  0x1b   : > { %1032 = vmatmul.mubr.msk.bf16.vlgmr.msra.gmra.mrb[0].mxu1 %vm308_vm0, %v1097_v5  ;;  %1019 = vmatprep.mubr.msk.bf16.mxu0 %vm308_vm0, %v1098_v6  ;;  %v1101_v9 = vld [vmem:[%s1255_s5 + $0x58] sm:$0xff]   ;;  %v1103_v11 = vld [vmem:[%s1255_s5 + $0x60] sm:$0xff]   ;;  %v1105_v13 = vld [vmem:[%s1255_s5 + $0x68] sm:$0xff]  }
  0x1c   : > { %1035 = vmatprep.mubr.msk.bf16.mxu1 %vm308_vm0, %v1099_v7  ;;  %v1106_v14 = vld [vmem:[%s1255_s5 + $0x30] sm:$0xff]   ;;  %v1108_v16 = vld [vmem:[%s1255_s5 + $0x38] sm:$0xff]   ;;  %p1119_p2 = por %p1118_p1, %p1117_p0 }
  0x1d   : > { %v1107_v15 = vld [vmem:[%s1255_s5 + $0x70] sm:$0xff]   ;;  %v1109_v17 = vld [vmem:[%s1255_s5 + $0x78] sm:$0xff]  }
  0x1e   : > { %p1120_p3 = pnand %p1119_p2, %p1113_p13 }
  0x22   : > { %1020 = vmatmul.mubr.msk.bf16.gmra.mrb[4].mxu0 %vm308_vm0, %v1100_v8 }
  0x23   : > { %1036 = vmatmul.mubr.msk.bf16.gmra.mrb[4].mxu1 %vm308_vm0, %v1101_v9  ;;  %1023 = vmatprep.mubr.msk.bf16.mxu0 %vm308_vm0, %v1102_v10 }
  0x24   : > { %1039 = vmatprep.mubr.msk.bf16.mxu1 %vm308_vm0, %v1103_v11 }
  0x2a   : > { %1024 = vmatmul.mubr.msk.bf16.gmra.mrb[8].mxu0 %vm308_vm0, %v1104_v12 }
  0x2b   : > { %1040 = vmatmul.mubr.msk.bf16.gmra.mrb[8].mxu1 %vm308_vm0, %v1105_v13  ;;  %1027 = vmatprep.mubr.msk.bf16.mxu0 %vm308_vm0, %v1106_v14 }
  0x2c   : > { %1043 = vmatprep.mubr.msk.bf16.mxu1 %vm308_vm0, %v1107_v15 }
  0x32   : > { %1028 = vmatmul.mubr.msk.bf16.gmra.mrb[12].mxu0 %vm308_vm0, %v1108_v16 }
  0x33   : > { %1044 = vmatmul.mubr.msk.bf16.gmra.mrb[12].mxu1 %vm308_vm0, %v1109_v17 }
  0xed   : > { %v1017_v19 = vpop.f32.mrb[0].mxu0 }
  0xee   : > { %v400_v20 = vadd.f32 %v1017_v19, %v1292_v18  ;;  %v1033_v21 = vpop.f32.mrb[0].mxu1  ;;  %v391_v22 = vpop.f32.mrb[1].mxu0 }
  0xef   : > { %v464_v23 = vadd.f32 %v1033_v21, %v1292_v18  ;;  %v392_v24 = vadd.f32 %v1292_v18, %v391_v22  ;;  %v455_v25 = vpop.f32.mrb[1].mxu1  ;;  %v1018_v26 = vpop.f32.mrb[2].mxu0 }
  0xf0   : > { %v456_v27 = vadd.f32 %v1292_v18, %v455_v25  ;;  %v403_v28 = vadd.f32 %v1018_v26, %v1292_v18  ;;  %v1034_v29 = vpop.f32.mrb[2].mxu1  ;;  %v394_v30 = vpop.f32.mrb[3].mxu0  ;;  %v520_v34 = vmax.f32 %v400_v20, 0.0 }
  0xf1   : > { %v467_v31 = vadd.f32 %v1034_v29, %v1292_v18  ;;  %v395_v32 = vadd.f32 %v1292_v18, %v394_v30  ;;  %v458_v33 = vpop.f32.mrb[3].mxu1  ;;  %v536_v37 = vmax.f32 %v464_v23, 0.0  ;;  %v518_v38 = vmax.f32 %v392_v24, 0.0 }
  0xf2   : > { %v521_v35 = vmax.f32 %v403_v28, 0.0  ;;  %v459_v36 = vadd.f32 %v1292_v18, %v458_v33  ;;  %v534_v41 = vmax.f32 %v456_v27, 0.0 }
  0xf3   : > { %v537_v39 = vmax.f32 %v467_v31, 0.0  ;;  %v519_v40 = vmax.f32 %v395_v32, 0.0 }
  0xf4   : > { %v906_v42 = vpack.c.bf16 %v521_v35, %v520_v34  ;;  %v535_v43 = vmax.f32 %v459_v36, 0.0 }
  0xf5   : > { %v946_v44 = vpack.c.bf16 %v537_v39, %v536_v37  ;;  %v901_v45 = vpack.c.bf16 %v519_v40, %v518_v38  ;;  %v1021_v46 = vpop.f32.mrb[4].mxu0 }
  0xf6   : > { %978 = vst [vmem:[%s1305_s10 + $0x8] sm:$0xff] %v906_v42   ;;  %v941_v47 = vpack.c.bf16 %v535_v43, %v534_v41  ;;  %v416_v48 = vadd.f32 %v1021_v46, %v1292_v18  ;;  %v1037_v49 = vpop.f32.mrb[4].mxu1  ;;  %v407_v50 = vpop.f32.mrb[5].mxu0 }
  0xf7   : > { %986 = vst [vmem:[%s1305_s10 + $0x48] sm:$0xff] %v946_v44   ;;  %902 = vst [vmem:[%s1305_s10] sm:$0xff] %v901_v45   ;;  %v480_v51 = vadd.f32 %v1037_v49, %v1292_v18  ;;  %v408_v52 = vadd.f32 %v1292_v18, %v407_v50  ;;  %v471_v53 = vpop.f32.mrb[5].mxu1  ;;  %v1022_v54 = vpop.f32.mrb[6].mxu0 }
  0xf8   : > { %985 = vst [vmem:[%s1305_s10 + $0x40] sm:$0xff] %v941_v47   ;;  %v472_v55 = vadd.f32 %v1292_v18, %v471_v53  ;;  %v419_v56 = vadd.f32 %v1022_v54, %v1292_v18  ;;  %v1038_v57 = vpop.f32.mrb[6].mxu1  ;;  %v410_v58 = vpop.f32.mrb[7].mxu0  ;;  %v524_v62 = vmax.f32 %v416_v48, 0.0 }
  0xf9   : > { %v483_v59 = vadd.f32 %v1038_v57, %v1292_v18  ;;  %v411_v60 = vadd.f32 %v1292_v18, %v410_v58  ;;  %v474_v61 = vpop.f32.mrb[7].mxu1  ;;  %v540_v1 = vmax.f32 %v480_v51, 0.0  ;;  %v522_v2 = vmax.f32 %v408_v52, 0.0 }
  0xfa   : > { %v525_v63 = vmax.f32 %v419_v56, 0.0  ;;  %v475_v0 = vadd.f32 %v1292_v18, %v474_v61  ;;  %v538_v5 = vmax.f32 %v472_v55, 0.0 }
  0xfb   : > { %v541_v3 = vmax.f32 %v483_v59, 0.0  ;;  %v523_v4 = vmax.f32 %v411_v60, 0.0 }
  0xfc   : > { %v916_v6 = vpack.c.bf16 %v525_v63, %v524_v62  ;;  %v539_v7 = vmax.f32 %v475_v0, 0.0 }
  0xfd   : > { %v956_v8 = vpack.c.bf16 %v541_v3, %v540_v1  ;;  %v911_v9 = vpack.c.bf16 %v523_v4, %v522_v2  ;;  %v1025_v10 = vpop.f32.mrb[8].mxu0 }
  0xfe   : > { %980 = vst [vmem:[%s1305_s10 + $0x18] sm:$0xff] %v916_v6   ;;  %v951_v11 = vpack.c.bf16 %v539_v7, %v538_v5  ;;  %v432_v12 = vadd.f32 %v1025_v10, %v1292_v18  ;;  %v1041_v13 = vpop.f32.mrb[8].mxu1  ;;  %v423_v14 = vpop.f32.mrb[9].mxu0 }
  0xff   : > { %988 = vst [vmem:[%s1305_s10 + $0x58] sm:$0xff] %v956_v8   ;;  %979 = vst [vmem:[%s1305_s10 + $0x10] sm:$0xff] %v911_v9   ;;  %v496_v15 = vadd.f32 %v1041_v13, %v1292_v18  ;;  %v424_v16 = vadd.f32 %v1292_v18, %v423_v14  ;;  %v487_v17 = vpop.f32.mrb[9].mxu1  ;;  %v1026_v19 = vpop.f32.mrb[10].mxu0 }
 0x100   : > { %987 = vst [vmem:[%s1305_s10 + $0x50] sm:$0xff] %v951_v11   ;;  %v488_v20 = vadd.f32 %v1292_v18, %v487_v17  ;;  %v435_v21 = vadd.f32 %v1026_v19, %v1292_v18  ;;  %v1042_v22 = vpop.f32.mrb[10].mxu1  ;;  %v426_v23 = vpop.f32.mrb[11].mxu0  ;;  %v528_v27 = vmax.f32 %v432_v12, 0.0 }
 0x101   : > { %v499_v24 = vadd.f32 %v1042_v22, %v1292_v18  ;;  %v427_v25 = vadd.f32 %v1292_v18, %v426_v23  ;;  %v490_v26 = vpop.f32.mrb[11].mxu1  ;;  %v544_v30 = vmax.f32 %v496_v15, 0.0  ;;  %v526_v31 = vmax.f32 %v424_v16, 0.0 }
 0x102   : > { %v529_v28 = vmax.f32 %v435_v21, 0.0  ;;  %v491_v29 = vadd.f32 %v1292_v18, %v490_v26  ;;  %v542_v34 = vmax.f32 %v488_v20, 0.0 }
 0x103   : > { %v545_v32 = vmax.f32 %v499_v24, 0.0  ;;  %v527_v33 = vmax.f32 %v427_v25, 0.0 }
 0x104   : > { %v926_v35 = vpack.c.bf16 %v529_v28, %v528_v27  ;;  %v543_v36 = vmax.f32 %v491_v29, 0.0 }
 0x105   : > { %v966_v37 = vpack.c.bf16 %v545_v32, %v544_v30  ;;  %v921_v38 = vpack.c.bf16 %v527_v33, %v526_v31  ;;  %v1029_v39 = vpop.f32.mrb[12].mxu0 }
 0x106   : > { %982 = vst [vmem:[%s1305_s10 + $0x28] sm:$0xff] %v926_v35   ;;  %v961_v40 = vpack.c.bf16 %v543_v36, %v542_v34  ;;  %v448_v41 = vadd.f32 %v1029_v39, %v1292_v18  ;;  %v1045_v42 = vpop.f32.mrb[12].mxu1  ;;  %v439_v43 = vpop.f32.mrb[13].mxu0 }
 0x107   : > { %990 = vst [vmem:[%s1305_s10 + $0x68] sm:$0xff] %v966_v37   ;;  %981 = vst [vmem:[%s1305_s10 + $0x20] sm:$0xff] %v921_v38   ;;  %v512_v44 = vadd.f32 %v1045_v42, %v1292_v18  ;;  %v440_v45 = vadd.f32 %v1292_v18, %v439_v43  ;;  %v503_v46 = vpop.f32.mrb[13].mxu1  ;;  %v1030_v47 = vpop.f32.mrb[14].mxu0 }
 0x108   : > { %989 = vst [vmem:[%s1305_s10 + $0x60] sm:$0xff] %v961_v40   ;;  %v504_v48 = vadd.f32 %v1292_v18, %v503_v46  ;;  %v451_v49 = vadd.f32 %v1030_v47, %v1292_v18  ;;  %v1046_v50 = vpop.f32.mrb[14].mxu1  ;;  %v442_v51 = vpop.f32.mrb[15].mxu0  ;;  %v532_v55 = vmax.f32 %v448_v41, 0.0 }
 0x109   : > { %v515_v52 = vadd.f32 %v1046_v50, %v1292_v18  ;;  %v443_v53 = vadd.f32 %v1292_v18, %v442_v51  ;;  %v506_v54 = vpop.f32.mrb[15].mxu1  ;;  %v548_v58 = vmax.f32 %v512_v44, 0.0  ;;  %v530_v59 = vmax.f32 %v440_v45, 0.0 }
 0x10a   : > { %v533_v56 = vmax.f32 %v451_v49, 0.0  ;;  %v507_v57 = vadd.f32 %v1292_v18, %v506_v54  ;;  %v546_v62 = vmax.f32 %v504_v48, 0.0 }
 0x10b   : > { %v549_v60 = vmax.f32 %v515_v52, 0.0  ;;  %v531_v61 = vmax.f32 %v443_v53, 0.0 }
 0x10c   : > { %v936_v63 = vpack.c.bf16 %v533_v56, %v532_v55  ;;  %v547_v0 = vmax.f32 %v507_v57, 0.0 }
 0x10d   : > { %v976_v1 = vpack.c.bf16 %v549_v60, %v548_v58  ;;  %v931_v2 = vpack.c.bf16 %v531_v61, %v530_v59 }
 0x10e   : > { %984 = vst [vmem:[%s1305_s10 + $0x38] sm:$0xff] %v936_v63   ;;  %v971_v18 = vpack.c.bf16 %v547_v0, %v546_v62 }
 0x10f   : > { %992 = vst [vmem:[%s1305_s10 + $0x78] sm:$0xff] %v976_v1   ;;  %983 = vst [vmem:[%s1305_s10 + $0x30] sm:$0xff] %v931_v2  }
 0x110   : > { %991 = vst [vmem:[%s1305_s10 + $0x70] sm:$0xff] %v971_v18  }
 0x111   : > { %1123 = shalt.err (!%p1120_p3)
}
 0x112   : > { %s1124_s29 = scalar_lea.hbm %s1348_s24, 2048  ;;  %s1128_s5 = scalar_lea.hbm %s1402_s3, 4096 }
 0x113   : > { %p1125_p4 = scmp.ne.s32.totalorder %s1348_s24, %s1124_s29  ;;  %p1129_p9 = scmp.lt.u32.totalorder %s1348_s24, %s1402_s3 }
 0x114   : > { %p1130_p10 = scmp.lt.u32.totalorder %s1128_s5, %s1124_s29  ;;  %p1132_p12 = scmp.lt.u32.totalorder %s1124_s29, %s1348_s24 }
 0x115   : > { %p1126_p7 = pnand %p1125_p4, %p1235_p5 }
 0x116   : > { %p1131_p11 = por %p1130_p10, %p1129_p9 }
 0x117   : > { %p1127_p8 = pneg %p1126_p7 }
 0x118   : > { %p1133_p13 = por %p1132_p12, %p1131_p11 }
 0x11a   : > { %p1134_p0 = pnand %p1133_p13, %p1127_p8 }
 0x11c   : > { %1137 = shalt.err (!%p1134_p0)
}
 0x11d   : > { %s1175_s8 = smov 64   ;;  %s1176_s9 = smov 4  }
 0x11e   : > { %1051 = dma.vmem_to_hbm [thread:$0]  (%p1235_p5), %s1350_s17, 2048, %s1348_s24, %s1358_s16, %s1175_s8, %s1175_s8, %s1176_s9  }
 0x11f PF: > { %p1057_p1 = scmp.ge.s32.totalorder %s1172_s15, 2  ;;  %s739_s10 = sand.u32 1, %s1160_s12  }
 0x120   : > { %s740_s11 = scalar_lea.sflag [#allocation3], %s739_s10 }
 0x121   : > { %p1054_p2 = pnand %p1057_p1, %p1239_p6 }
 0x123   : > { %1155 = dma.done.wait (!%p1054_p2), %s740_s11, 2048  }
 0x124   : > { %1157 = vsyncadd (!%p1054_p2), %s740_s11, 4294965248  ;;  %p13_p3 = scmp.ge.s32.totalorder %s1222_s18, 4   ;;  %s1405_s12 = smov %s1164_s13 }
 0x125   : > { %s1406_s13 = smov %s1168_s14  ;;  %s1407_s14 = smov %s1233_s21 }
 0x126   : > { %s1408_s15 = smov %s1222_s18  ;;  %15 = sbr.rel (!%p13_p3) target bundleno = 3 (0x3), region = 67 }
 0x12d   :  { %745 = vsyncpa [#allocation3], 1 }
 0x12e   :  { %747 = vsyncpa [#allocation3 + $0x1], 1 }

</bundles_post_ra>
